<compile_context>
chip_gen: v6e
topology: v6e:2x2x1
jax: 0.10.0
libtpu: 0.0.40
codegen_flags: <defaults>
</compile_context>

<pallas_src>
import jax
import jax.numpy as jnp
from jax.experimental import pallas as pl
from jax.experimental.pallas import tpu as pltpu


_VMEM_BUDGET = 40 * 1024 * 1024   # target tile footprint (double-buffered)
_VMEM_CAP = 48 * 1024 * 1024      # scoped-VMEM request ceiling (v7x-safe)


def _round_up(x: int, mult: int) -> int:
    return ((x + mult - 1) // mult) * mult


def _pick_divisor_tile(total: int, want: int, minimum: int = 128) -> int:
    """Largest multiple of 128 that is <= want (>= minimum) and divides total."""
    cand = max(minimum, (min(want, total) // 128) * 128)
    while total % cand != 0:
        cand -= 128
    return cand


# ----------------------------------------------------------------------------
# Kernels
# ----------------------------------------------------------------------------
def _mlp_kernel_fullk(x_ref, w_ref, b_ref, o_ref):
    # x_ref: (TM, H)   w_ref: (H, TN)  (in, out layout)   b_ref: (1, TN)
    acc = jnp.dot(x_ref[...], w_ref[...], preferred_element_type=jnp.float32)
    acc = acc + b_ref[...].astype(jnp.float32)
    o_ref[...] = jnp.tanh(acc).astype(o_ref.dtype)


def _mlp_kernel_ksplit(x_ref, w_ref, b_ref, o_ref, acc_ref):
    # x_ref: (TM, TK)  w_ref: (TK, TN)  b_ref: (1, TN)  acc_ref: (TM, TN) f32
    # NOTE: correctness relies on K being the innermost grid axis so the k==0
    # bias-broadcast overwrites stale scratch for every (i, j) tile.
    k = pl.program_id(2)

    @pl.when(k == 0)
    def _init():
        acc_ref[...] = jnp.broadcast_to(
            b_ref[...].astype(jnp.float32), acc_ref.shape
        )

    acc_ref[...] += jnp.dot(
        x_ref[...], w_ref[...], preferred_element_type=jnp.float32
    )

    @pl.when(k == pl.num_programs(2) - 1)
    def _fin():
        o_ref[...] = jnp.tanh(acc_ref[...]).astype(o_ref.dtype)


# ----------------------------------------------------------------------------
# Param prep (one-time): transpose (out,in) -> (in,out), pad H to 128, cast.
# ----------------------------------------------------------------------------
def prepare_mlp_params(weight, bias, *, compute_dtype=jnp.bfloat16):
    """weight: (H, H) PyTorch nn.Linear (out, in) layout; bias: (H,)."""
    hidden = weight.shape[0]
    h_p = _round_up(hidden, 128)
    w_t = jnp.asarray(weight).T                      # (in, out)
    b = jnp.asarray(bias)
    if h_p != hidden:
        w_t = jnp.pad(w_t, ((0, h_p - hidden), (0, h_p - hidden)))
        b = jnp.pad(b, (0, h_p - hidden))
    return w_t.astype(compute_dtype), b.reshape(1, h_p).astype(jnp.float32)


# ----------------------------------------------------------------------------
# Forward: tanh(x @ W^T + b), consuming the prepared (in,out) weight.
# ----------------------------------------------------------------------------
def mlp_forward(x, w_prep, b_prep, *, out_dtype=None, tm=1024, tn=512):
    orig_shape = x.shape
    hidden = orig_shape[-1]
    h_p = w_prep.shape[0]
    assert w_prep.shape == (h_p, h_p) and b_prep.shape == (1, h_p)
    compute_dtype = w_prep.dtype
    out_dtype = x.dtype if out_dtype is None else out_dtype

    # Cast x once in the wrapper (before the DMA), not inside the kernel.
    x2d = x.reshape(-1, hidden).astype(compute_dtype)
    m = x2d.shape[0]

    # --- balanced M tiling: pad by at most 7 rows --------------------------
    m_p8 = _round_up(m, 8)
    gm = pl.cdiv(m_p8, tm)
    tm_eff = _round_up(pl.cdiv(m_p8, gm), 8)

    # --- N tiling (decoupled from K) ---------------------------------------
    tn_eff = _pick_divisor_tile(h_p, tn)
    if gm == 1 and h_p // tn_eff < 2 and h_p >= 256:
        # guarantee >=2 parallel blocks so both v7x TensorCores get work
        tn_eff = _pick_divisor_tile(h_p, h_p // 2)
    gn = h_p // tn_eff

    in_isz = jnp.dtype(compute_dtype).itemsize
    out_isz = jnp.dtype(out_dtype).itemsize

    def fullk_bytes(tm_, tn_):
        # double-buffered x / W / bias / out tiles
        return 2 * (tm_ * h_p * in_isz + h_p * tn_ * in_isz
                    + tn_ * 4 + tm_ * tn_ * out_isz)

    # --- choose collapsed-K (preferred) vs K-split --------------------------
    use_fullk = fullk_bytes(tm_eff, tn_eff) <= _VMEM_BUDGET
    while not use_fullk and tm_eff > 256:
        gm += 1
        tm_eff = _round_up(pl.cdiv(m_p8, gm), 8)
        use_fullk = fullk_bytes(tm_eff, tn_eff) <= _VMEM_BUDGET
    m_p = gm * tm_eff

    # --- pad x (no-op when already aligned) ---------------------------------
    if (m_p, h_p) != (m, hidden):
        x2d = jnp.pad(x2d, ((0, m_p - m), (0, h_p - hidden)))

    cost = pl.CostEstimate(
        flops=2 * m_p * h_p * h_p,
        transcendentals=m_p * h_p,
        bytes_accessed=(in_isz * (m_p * h_p + h_p * h_p)
                        + 4 * h_p + out_isz * m_p * h_p),
    )

    if use_fullk:
        tile_bytes = fullk_bytes(tm_eff, tn_eff)
        vmem_limit = min(max(int(tile_bytes * 1.25), 4 << 20), _VMEM_CAP)
        out2d = pl.pallas_call(
            _mlp_kernel_fullk,
            out_shape=jax.ShapeDtypeStruct((m_p, h_p), out_dtype),
            grid_spec=pltpu.PrefetchScalarGridSpec(
                num_scalar_prefetch=0,
                grid=(gm, gn),
                in_specs=[
                    pl.BlockSpec((tm_eff, h_p), lambda i, j: (i, 0)),   # x
                    pl.BlockSpec((h_p, tn_eff), lambda i, j: (0, j)),   # W (in,out)
                    pl.BlockSpec((1, tn_eff), lambda i, j: (0, j)),     # bias
                ],
                out_specs=pl.BlockSpec((tm_eff, tn_eff), lambda i, j: (i, j)),
            ),
            compiler_params=pltpu.CompilerParams(
                dimension_semantics=("parallel", "parallel"),
                vmem_limit_bytes=vmem_limit,
            ),
            cost_estimate=cost,
        )(x2d, w_prep, b_prep)
    else:
        # K-split fallback for very large hidden sizes.
        tk_eff = _pick_divisor_tile(h_p, 512)
        gk = h_p // tk_eff
        tile_bytes = (2 * (tm_eff * tk_eff * in_isz + tk_eff * tn_eff * in_isz
                           + tn_eff * 4 + tm_eff * tn_eff * out_isz)
                      + tm_eff * tn_eff * 4)            # resident f32 accumulator
        vmem_limit = min(max(int(tile_bytes * 1.25), 4 << 20), _VMEM_CAP)
        out2d = pl.pallas_call(
            _mlp_kernel_ksplit,
            out_shape=jax.ShapeDtypeStruct((m_p, h_p), out_dtype),
            grid_spec=pltpu.PrefetchScalarGridSpec(
                num_scalar_prefetch=0,
                grid=(gm, gn, gk),
                in_specs=[
                    pl.BlockSpec((tm_eff, tk_eff), lambda i, j, k: (i, k)),   # x
                    pl.BlockSpec((tk_eff, tn_eff), lambda i, j, k: (k, j)),   # W
                    pl.BlockSpec((1, tn_eff), lambda i, j, k: (0, j)),        # bias
                ],
                out_specs=pl.BlockSpec((tm_eff, tn_eff), lambda i, j, k: (i, j)),
                scratch_shapes=[pltpu.VMEM((tm_eff, tn_eff), jnp.float32)],
            ),
            compiler_params=pltpu.CompilerParams(
                dimension_semantics=("parallel", "parallel", "arbitrary"),
                vmem_limit_bytes=vmem_limit,
            ),
            cost_estimate=cost,
        )(x2d, w_prep, b_prep)

    return out2d[:m, :hidden].reshape(orig_shape[:-1] + (hidden,))


def init_mlp_params(key, hidden_size, dtype=jnp.float32):
    # Xavier-uniform for the (out, in) weight, zero bias (matches _init_weight).
    limit = (6.0 / (hidden_size + hidden_size)) ** 0.5
    weight = jax.random.uniform(
        key, (hidden_size, hidden_size), minval=-limit, maxval=limit, dtype=dtype
    )
    bias = jnp.zeros((hidden_size,), dtype=dtype)
    return weight, bias


if __name__ == "__main__":
    key = jax.random.PRNGKey(0)
    k_x, k_w, k_b = jax.random.split(key, 3)

    batch, seq, hidden = 2, 8, 32
    x = jax.random.normal(k_x, (batch, seq, hidden), dtype=jnp.float32)
    weight, _zero_bias = init_mlp_params(k_w, hidden)
    # Non-zero bias so the bias path is actually exercised.
    bias = 0.1 * jax.random.normal(k_b, (hidden,), dtype=jnp.float32)

    # Reference (same math as the PyTorch forward).
    ref = jnp.tanh(x @ weight.T + bias)

    # Exact f32 operand path (tight correctness check).
    w32, b32 = prepare_mlp_params(weight, bias, compute_dtype=jnp.float32)
    out32 = jax.block_until_ready(mlp_forward(x, w32, b32))
    assert out32.shape == x.shape
    assert jnp.allclose(out32, ref, atol=1e-5), "f32 path mismatch vs reference"

    # Default bf16 MXU path (operands cast once at prep / wrapper time).
    wbf, bbf = prepare_mlp_params(weight, bias)       # bf16 weight
    outbf = jax.block_until_ready(mlp_forward(x, wbf, bbf))
    assert outbf.shape == x.shape
    assert jnp.allclose(outbf, ref, atol=3e-2, rtol=3e-2), "bf16 path mismatch"

    # Ragged-M / multi-N-tile shape: exercises balanced M tiling and gn > 1.
    m2, h2 = 600, 384
    x2 = jax.random.normal(k_x, (m2, h2), dtype=jnp.float32)
    w2, _ = init_mlp_params(k_w, h2)
    b2 = 0.05 * jax.random.normal(k_b, (h2,), dtype=jnp.float32)
    ref2 = jnp.tanh(x2 @ w2.T + b2)
    w2p, b2p = prepare_mlp_params(w2, b2)             # bf16
    out2 = jax.block_until_ready(mlp_forward(x2, w2p, b2p))
    assert out2.shape == (m2, h2)
    assert jnp.allclose(out2, ref2, atol=3e-2, rtol=3e-2), "bf16 600x384 mismatch"

    print("KERNEL_OK")
</pallas_src>

<mosaic_0001>
module attributes {stable_mosaic.version = 11 : i64} {
  func.func @_mlp_kernel_fullk(%arg0: i32, %arg1: i32, %arg2: memref<16x128xf32, #tpu.memory_space<vmem>>, %arg3: memref<128x128xf32, #tpu.memory_space<vmem>>, %arg4: memref<1x128xf32, #tpu.memory_space<vmem>>, %arg5: memref<16x128xf32, #tpu.memory_space<vmem>>) attributes {dimension_semantics = [#tpu.dimension_semantics<parallel>, #tpu.dimension_semantics<parallel>], iteration_bounds = array<i64: 1, 1>, scalar_prefetch = 0 : i64, scratch_operands = 0 : i64, tpu.core_type = #tpu.core_type<tc>, window_params = [{transform_indices = @transform_0, window_bounds = array<i64: 16, 128>}, {transform_indices = @transform_1, window_bounds = array<i64: 128, 128>}, {transform_indices = @transform_2, window_bounds = array<i64: 1, 128>}, {transform_indices = @transform_3, window_bounds = array<i64: 16, 128>}]} {
    %c0 = arith.constant 0 : index
    %c0_0 = arith.constant 0 : index
    %0 = vector.load %arg2[%c0, %c0_0] : memref<16x128xf32, #tpu.memory_space<vmem>>, vector<16x128xf32>
    %c0_1 = arith.constant 0 : index
    %c0_2 = arith.constant 0 : index
    %1 = vector.load %arg3[%c0_1, %c0_2] : memref<128x128xf32, #tpu.memory_space<vmem>>, vector<128x128xf32>
    %cst = arith.constant dense<0.000000e+00> : vector<16x128xf32>
    %2 = tpu.matmul %0, %1, %cst {dimension_numbers = #tpu.dot_dimension_numbers<[1], [0], [0], [1], [0, 0, 1, 1], [], []>} : vector<16x128xf32>, vector<128x128xf32>, vector<16x128xf32> -> vector<16x128xf32>
    %c0_3 = arith.constant 0 : index
    %c0_4 = arith.constant 0 : index
    %3 = vector.load %arg4[%c0_3, %c0_4] : memref<1x128xf32, #tpu.memory_space<vmem>>, vector<1x128xf32>
    %4 = vector.broadcast %3 : vector<1x128xf32> to vector<16x128xf32>
    %5 = arith.addf %2, %4 : vector<16x128xf32>
    %6 = math.tanh %5 : vector<16x128xf32>
    %c0_5 = arith.constant 0 : index
    %c0_6 = arith.constant 0 : index
    %7 = vector.load %arg5[%c0_5, %c0_6] : memref<16x128xf32, #tpu.memory_space<vmem>>, vector<16x128xf32>
    tpu.vector_store %arg5[%c0_5, %c0_6], %6 {strides = array<i32>} : memref<16x128xf32, #tpu.memory_space<vmem>>, vector<16x128xf32>,
    return
  }
  func.func @transform_0(%arg0: i32, %arg1: i32) -> (i32, i32) {
    %c0_i32 = arith.constant 0 : i32
    %c0_i32_0 = arith.constant 0 : i32
    return %arg0, %c0_i32 : i32, i32
  }
  func.func @transform_1(%arg0: i32, %arg1: i32) -> (i32, i32) {
    %c0_i32 = arith.constant 0 : i32
    %c0_i32_0 = arith.constant 0 : i32
    return %c0_i32, %arg1 : i32, i32
  }
  func.func @transform_2(%arg0: i32, %arg1: i32) -> (i32, i32) {
    %c0_i32 = arith.constant 0 : i32
    %c0_i32_0 = arith.constant 0 : i32
    return %c0_i32, %arg1 : i32, i32
  }
  func.func @transform_3(%arg0: i32, %arg1: i32) -> (i32, i32) {
    %c0_i32 = arith.constant 0 : i32
    return %arg0, %arg1 : i32, i32
  }
}

</mosaic_0001>

<bundles_post_ra>
// kernel: tpu_custom_call.1
= control target key start
LH: loop header
LB: loop body
LE: loop exit
PB: predicated region body
PF: predicated region fallthrough
CT: control target
= control target key end

     0   :  { %8 = vsyncpa [#allocation3], 0  ;;  %s340_s0 = inlined_call_operand.hbm [shape: f32[16,128], index: 0, kind: input, shape index: {}]   ;;  %s341_s1 = inlined_call_operand.hbm [shape: f32[128,128], index: 1, kind: input, shape index: {}]   ;;  %s342_s2 = inlined_call_operand.vmem [shape: f32[1,128], index: 2, kind: input, shape index: {}]   ;;  %s343_s3 = inlined_call_operand.hbm [shape: f32[16,128], index: 3, kind: output, shape index: {}]  }
   0x1   :  { %9 = vsyncpa [#allocation6], 0 }
   0x2   :  { %10 = vsyncpa [#allocation4], 0  ;;  %s294_s12 = smov [#allocation2]  }
   0x3   :  { %s16_s13 = sshll.u32 %s294_s12, 4  ;;  %s17_s13 = int_to_ptr.vmem [resolvable:$true] %s16_s13 }
   0x4   :  { %s236_s14 = scalar_lea.vmem %s17_s13, 256  ;;  %p241_p1 = scmp.lt.s32.totalorder %s17_s13, %s17_s13 }
   0x5   :  { %p237_p0 = scmp.ne.s32.totalorder %s17_s13, %s236_s14  ;;  %p242_p2 = scmp.lt.s32.totalorder %s236_s14, %s236_s14 }
   0x7   :  { %p243_p3 = por %p242_p2, %p241_p1 }
   0x9   :  { %p244_p4 = pnand %p243_p3, %p237_p0 }
   0xb   :  { %247 = shalt.err (!%p244_p4)
}
   0xc   :  { %s295_s15 = smov 128   ;;  %s296_s16 = smov 8  }
   0xd   :  { %22 = dma.hbm_to_vmem [thread:$0]  %s340_s0, 256, %s17_s13, [#allocation3], %s295_s15, %s295_s15, %s296_s16  }
   0xe   :  { %s297_s19 = smov [#allocation5]  }
   0xf   :  { %s28_s20 = sshll.u32 %s297_s19, 4  ;;  %s29_s20 = int_to_ptr.vmem [resolvable:$true] %s28_s20 }
  0x10   :  { %s256_s21 = scalar_lea.vmem %s29_s20, 2048  ;;  %p261_p6 = scmp.lt.s32.totalorder %s29_s20, %s29_s20 }
  0x11   :  { %p257_p5 = scmp.ne.s32.totalorder %s29_s20, %s256_s21  ;;  %p262_p7 = scmp.lt.s32.totalorder %s256_s21, %s256_s21 }
  0x13   :  { %p263_p8 = por %p262_p7, %p261_p6 }
  0x15   :  { %p264_p9 = pnand %p263_p8, %p257_p5 }
  0x17   :  { %267 = shalt.err (!%p264_p9)
}
  0x18   :  { %34 = dma.hbm_to_vmem [thread:$0]  %s341_s1, 2048, %s29_s20, [#allocation6], %s295_s15, %s295_s15, %s296_s16  }
  0x19   :  { %288 = dma.done.wait [#allocation3], 256  }
  0x1a   :  { %289 = vsyncadd [#allocation3], 4294967040 }
  0x1b   :  { %290 = dma.done.wait [#allocation6], 2048  }
  0x1c   :  { %291 = vsyncadd [#allocation6], 4294965248  ;;  %v60_v0 = vld [vmem:[#allocation5 + $0x78] sm:$0xff]  ;;  %v59_v1 = vld [vmem:[#allocation5 + $0x70] sm:$0xff]  ;;  %s298_s24 = smov [#allocation7]  }
  0x1d   :  { %184 = vmatprep.subr.mxu0 %v60_v0  ;;  %v58_v2 = vld [vmem:[#allocation5 + $0x68] sm:$0xff]  ;;  %v57_v3 = vld [vmem:[#allocation5 + $0x60] sm:$0xff]  ;;  %v43_v4 = vld [vmem:[#allocation2] sm:$0xff]  ;;  %s152_s25 = sshll.u32 %s298_s24, 4  ;;  %s153_s25 = int_to_ptr.vmem [resolvable:$true] %s152_s25 }
  0x1e   :  { %185 = vmatpush3.msra.mxu0 %v60_v0  ;;  %v56_v5 = vld [vmem:[#allocation5 + $0x58] sm:$0xff]  ;;  %216 = vmatprep.mubr.f32.mxu0 %v43_v4  ;;  %v55_v6 = vld [vmem:[#allocation5 + $0x50] sm:$0xff]  ;;  %v54_v7 = vld [vmem:[#allocation5 + $0x48] sm:$0xff]  ;;  %s268_s26 = scalar_lea.vmem %s153_s25, 256  ;;  %p273_p11 = scmp.lt.s32.totalorder %s153_s25, %s153_s25 }
  0x1f   :  { %186 = vmatprep.subr.mxu0 %v59_v1  ;;  %v53_v8 = vld [vmem:[#allocation5 + $0x40] sm:$0xff]  ;;  %v52_v9 = vld [vmem:[#allocation5 + $0x38] sm:$0xff]  ;;  %v51_v10 = vld [vmem:[#allocation5 + $0x30] sm:$0xff]  ;;  %p269_p10 = scmp.ne.s32.totalorder %s153_s25, %s268_s26  ;;  %p274_p12 = scmp.lt.s32.totalorder %s268_s26, %s268_s26 }
  0x20   :  { %187 = vmatpush3.msra.mxu0 %v59_v1  ;;  %v50_v11 = vld [vmem:[#allocation5 + $0x28] sm:$0xff]  ;;  %v49_v12 = vld [vmem:[#allocation5 + $0x20] sm:$0xff]  ;;  %v48_v13 = vld [vmem:[#allocation5 + $0x18] sm:$0xff] }
  0x21   :  { %188 = vmatprep.subr.mxu0 %v58_v2  ;;  %v47_v14 = vld [vmem:[#allocation5 + $0x10] sm:$0xff]  ;;  %v46_v15 = vld [vmem:[#allocation5 + $0x8] sm:$0xff]  ;;  %v45_v16 = vld [vmem:[#allocation5] sm:$0xff]  ;;  %p275_p13 = por %p274_p12, %p273_p11 }
  0x22   :  { %189 = vmatpush3.msra.mxu0 %v58_v2  ;;  %v44_v17 = vld [vmem:[#allocation2 + $0x8] sm:$0xff]  ;;  %v165_v18 = vld [vmem:[%s342_s2] ss:$0 sm:$0xff] }
  0x23   :  { %190 = vmatprep.subr.mxu0 %v57_v3  ;;  %p276_p0 = pnand %p275_p13, %p269_p10 }
  0x24   :  { %191 = vmatpush3.msra.mxu0 %v57_v3 }
  0x25   :  { %192 = vmatprep.subr.mxu0 %v56_v5 }
  0x26   :  { %193 = vmatpush3.msra.mxu0 %v56_v5 }
  0x27   :  { %194 = vmatprep.subr.mxu0 %v55_v6 }
  0x28   :  { %195 = vmatpush3.msra.mxu0 %v55_v6 }
  0x29   :  { %196 = vmatprep.subr.mxu0 %v54_v7 }
  0x2a   :  { %197 = vmatpush3.msra.mxu0 %v54_v7 }
  0x2b   :  { %198 = vmatprep.subr.mxu0 %v53_v8 }
  0x2c   :  { %199 = vmatpush3.msra.mxu0 %v53_v8 }
  0x2d   :  { %200 = vmatprep.subr.mxu0 %v52_v9 }
  0x2e   :  { %201 = vmatpush3.msra.mxu0 %v52_v9 }
  0x2f   :  { %202 = vmatprep.subr.mxu0 %v51_v10 }
  0x30   :  { %203 = vmatpush3.msra.mxu0 %v51_v10 }
  0x31   :  { %204 = vmatprep.subr.mxu0 %v50_v11 }
  0x32   :  { %205 = vmatpush3.msra.mxu0 %v50_v11 }
  0x33   :  { %206 = vmatprep.subr.mxu0 %v49_v12 }
  0x34   :  { %207 = vmatpush3.msra.mxu0 %v49_v12 }
  0x35   :  { %208 = vmatprep.subr.mxu0 %v48_v13 }
  0x36   :  { %209 = vmatpush3.msra.mxu0 %v48_v13 }
  0x37   :  { %210 = vmatprep.subr.mxu0 %v47_v14 }
  0x38   :  { %211 = vmatpush3.msra.mxu0 %v47_v14 }
  0x39   :  { %212 = vmatprep.subr.mxu0 %v46_v15 }
  0x3a   :  { %213 = vmatpush3.msra.mxu0 %v46_v15 }
  0x3b   :  { %214 = vmatprep.subr.mxu0 %v45_v16 }
  0x3c   :  { %215 = vmatpush3.msra.mxu0 %v45_v16 }
  0x3d   :  { %217 = vmatmul.mubr.f32.vlgmr.msra.gmra.mxu0 %v44_v17 }
  0xfd   :  { %v218_v19 = vpop.f32.mrf.mxu0 }
  0xfe   :  { %v140_v20 = vadd.f32 %v218_v19, %v165_v18 }
  0xff   :  { %v134_v21 = vpop.f32.mrf.mxu0 }
 0x100   :  { %224 = vtanh.f32 %v140_v20  ;;  %v135_v22 = vadd.f32 %v165_v18, %v134_v21 }
 0x102   :  { %226 = vtanh.f32 %v135_v22 }
 0x10d   :  { %v225_v23 = vpop.eup %224 }
 0x10e   :  { %146 = vst [vmem:[#allocation7 + $0x8] sm:$0xff] %v225_v23 }
 0x10f   :  { %v227_v24 = vpop.eup %226 }
 0x110   :  { %145 = vst [vmem:[#allocation7] sm:$0xff] %v227_v24 }
 0x111   :  { %279 = shalt.err (!%p276_p0)
}
 0x112   :  { %158 = dma.vmem_to_hbm [thread:$0]  %s153_s25, 256, %s343_s3, [#allocation4], %s295_s15, %s295_s15, %s296_s16  }
 0x113   :  { %292 = dma.done.wait [#allocation4], 256  }
 0x114   :  { %293 = vsyncadd [#allocation4], 4294967040 }
 0x115   :  { %162 = vsyncpa [#allocation3], 1 }
 0x116   :  { %163 = vsyncpa [#allocation6], 1 }
 0x117   :  { %164 = vsyncpa [#allocation4], 1 }

</bundles_post_ra>
